<compile_context>
chip_gen: v5e
topology: v5e:2x2
jax: 0.10.0
libtpu: 0.0.40
codegen_flags: <defaults>
</compile_context>

<pallas_src>
import numpy as np
import jax
import jax.numpy as jnp
from jax.experimental import pallas as pl
from jax.experimental.pallas import tpu as pltpu


# ----------------------------------------------------------------------------
# Mask construction (numpy glue, identical semantics to the PyTorch module)
# ----------------------------------------------------------------------------
def optimize_single_mask_greedy(A, n_hidden):
    A_nonzero = A[~np.all(A == 0, axis=1), :]
    n_nonzero_rows = A_nonzero.shape[0]
    M2 = np.zeros((n_hidden, A.shape[1]))
    for i in range(n_hidden):
        M2[i, :] = A_nonzero[i % n_nonzero_rows]
    M1 = np.ones((A.shape[0], n_hidden))
    for i in range(M1.shape[0]):
        Ai_zero = np.where(A[i, :] == 0)[0]
        row_idx = np.unique(np.where(M2[:, Ai_zero] == 1)[0])
        M1[i, row_idx] = 0.0
    return M1, M2


def optimize_all_masks(hidden_sizes, A):
    # TODO(synk): only the 'greedy' opt_type is implemented; the Gurobi-based
    # variants (IP/IP_alt/LP_relax/IP_var) are host-side solver code with no kernel
    # equivalent.
    masks = []
    constraint = np.copy(A)
    M1 = None
    for l in hidden_sizes:
        M1, M2 = optimize_single_mask_greedy(constraint, l)
        constraint = M1
        masks = masks + [M2.T]
    masks = masks + [M1.T]
    return masks


def check_masks(mask_list, A):
    mask_prod = mask_list[-1].T
    for i in np.arange(len(mask_list) - 2, -1, -1):
        mask_prod = np.dot(mask_prod, mask_list[i].T)
    constraint = (mask_prod > 0) * 1.0 - A
    if np.any(constraint != 0.0):
        raise ValueError("Constraints are not met. Do not proceed with masks.")


def _round_up(n, m):
    return ((n + m - 1) // m) * m


# ----------------------------------------------------------------------------
# Pallas kernel: fused 3-layer masked-MLP chain, transposed (batch on lanes)
# ----------------------------------------------------------------------------
def made_kernel(x_ref, w1_ref, b1_ref, w2_ref, b2_ref, w3_ref, b3_ref, oT_ref):
    # x_ref : (tb, nin)  f32   -- untransposed batch tile (cast to bf16 in-kernel)
    # wi_ref: (out_i, in_i) bf16 (mask folded in);  bi_ref: (out_i, 1) f32
    # oT_ref: (nout, tb) bf16  -- batch on the lane axis (lane-dense stores)
    xb = x_ref[...].astype(jnp.bfloat16)                       # free VPU cast
    # h^T = W1 @ x^T via an NT contraction over nin: no host-side transpose pass.
    h = jax.lax.dot_general(
        w1_ref[...], xb,
        dimension_numbers=(((1,), (1,)), ((), ())),
        preferred_element_type=jnp.float32)                    # (h1, tb)
    h = jnp.maximum(h + b1_ref[...], 0.0).astype(jnp.bfloat16)

    h = jnp.dot(w2_ref[...], h, preferred_element_type=jnp.float32)   # (h2, tb)
    h = jnp.maximum(h + b2_ref[...], 0.0).astype(jnp.bfloat16)

    y = jnp.dot(w3_ref[...], h, preferred_element_type=jnp.float32)   # (nout, tb)
    oT_ref[...] = (y + b3_ref[...]).astype(oT_ref.dtype)       # no final act (net.pop())


def made_forward_pallas(x, params, *, tb=4096, min_tiles=1):
    """x: (B, nin) float32; params: list of (W_eff, b) with W_eff = mask*W, (out, in) bf16.

    tb        : soft cap on the batch tile (rounded to a multiple of 512).
    min_tiles : minimum number of grid steps; pass 2 on megacore (v7x) parts so
                dimension_semantics=("parallel",) keeps both TensorCores busy.
    Returns (B, nin, nout//nin) float32 (kernel writes bf16, cast back after the
    final reshape/permute — a deliberate deviation from the f32 PyTorch module).
    """
    (w1, b1), (w2, b2), (w3, b3) = params
    B, nin = x.shape
    h1 = w1.shape[0]
    h2 = w2.shape[0]
    nout = w3.shape[0]
    k = nout // nin

    # Tile selection: multiples of 512 (feeds the full MXU lane groups on
    # v5e/v6e/v7x); as few, as large tiles as the batch allows.
    n_tiles = max(int(min_tiles), int(pl.cdiv(_round_up(B, 512), tb)))
    tb = _round_up(pl.cdiv(B, n_tiles), 512)
    Bp = n_tiles * tb
    if Bp != B:
        x = jnp.pad(x, ((0, Bp - B), (0, 0)))       # padded rows compute bias-only junk, sliced off

    resident = lambda i: (0, 0)                      # weights/biases stay VMEM-resident across the grid
    yT = pl.pallas_call(
        made_kernel,
        out_shape=jax.ShapeDtypeStruct((nout, Bp), jnp.bfloat16),
        grid=(n_tiles,),
        in_specs=[
            pl.BlockSpec((tb, nin), lambda i: (i, 0)),     # streamed f32 batch tile (untransposed)
            pl.BlockSpec((h1, nin), resident),
            pl.BlockSpec((h1, 1), resident),
            pl.BlockSpec((h2, h1), resident),
            pl.BlockSpec((h2, 1), resident),
            pl.BlockSpec((nout, h2), resident),
            pl.BlockSpec((nout, 1), resident),
        ],
        out_specs=pl.BlockSpec((nout, tb), lambda i: (0, i)),
        compiler_params=pltpu.CompilerParams(
            dimension_semantics=("parallel",),
            # Explicit scoped-VMEM budget with headroom (actual footprint ~1 MiB at
            # tb=4096); 32 MiB is safe on v5e/v6e/v7x alike.
            vmem_limit_bytes=32 * 1024 * 1024,
        ),
    )(x, w1, b1, w2, b2, w3, b3)

    # Match PyTorch: net(x).view(B, -1, nin).permute(0, 2, 1)  -> (B, nin, k)
    yT = yT[:, :B]                                   # drop batch padding
    out = jnp.transpose(yT.reshape(k, nin, B), (2, 1, 0))
    return out.astype(jnp.float32)


# ----------------------------------------------------------------------------
# Parameter setup (deterministic, synthetic) — PyTorch (out, in) weight layout
# ----------------------------------------------------------------------------
def build_made_params(key, nin, hidden_sizes, nout):
    # MADE masks from the greedy optimizer, A = strictly lower triangular ones.
    A = np.tril(np.ones((nin, nin)), -1)
    masks = optimize_all_masks(hidden_sizes, A)      # entries are (in, out)
    check_masks(masks, A)
    if nout > nin:
        k = int(nout / nin)
        masks[-1] = np.concatenate([masks[-1]] * k, axis=1)

    hs = [nin] + list(hidden_sizes) + [nout]
    params = []
    for li, (h0, h1) in enumerate(zip(hs, hs[1:])):
        key, kw, kb = jax.random.split(key, 3)
        bound = 1.0 / np.sqrt(h0)
        W = jax.random.uniform(kw, (h1, h0), jnp.float32, -bound, bound)   # (out, in)
        b = jax.random.uniform(kb, (h1, 1), jnp.float32, -bound, bound)    # (out, 1)
        mask = jnp.asarray(masks[li].T, dtype=jnp.float32)                 # (out, in)
        # Fold mask into the weight (MaskedLinear semantics), store bf16 for the MXU.
        # NOTE: valid only for frozen weights; re-fold the mask after any update.
        params.append(((mask * W).astype(jnp.bfloat16), b))
    return params


def made_forward_ref(x, params):
    """Pure-JAX reference mirroring the kernel: bf16 weights/activations, f32 MXU
    accumulation, bf16 output rounding."""
    (w1, b1), (w2, b2), (w3, b3) = params            # wi: (out, in) bf16; bi: (out, 1) f32
    h = x.astype(jnp.bfloat16)
    h = jnp.maximum(jnp.dot(h, w1.T, preferred_element_type=jnp.float32) + b1[:, 0], 0.0)
    h = jnp.maximum(jnp.dot(h.astype(jnp.bfloat16), w2.T,
                            preferred_element_type=jnp.float32) + b2[:, 0], 0.0)
    y = jnp.dot(h.astype(jnp.bfloat16), w3.T, preferred_element_type=jnp.float32) + b3[:, 0]
    y = y.astype(jnp.bfloat16).astype(jnp.float32)   # kernel writes bf16
    B, nin = x.shape
    k = y.shape[1] // nin
    return jnp.transpose(y.reshape(B, k, nin), (0, 2, 1))


if __name__ == "__main__":
    nin = 8
    hidden_sizes = [32, 32]
    nout = 16          # k = 2 output params per input dim
    batch = 4

    key = jax.random.PRNGKey(0)
    key, kx = jax.random.split(key)
    x = jax.random.normal(kx, (batch, nin), dtype=jnp.float32)

    params = build_made_params(key, nin, hidden_sizes, nout)

    out = made_forward_pallas(x, params)
    out = jax.block_until_ready(out)

    ref = made_forward_ref(x, params)
    assert out.shape == (batch, nin, nout // nin), out.shape
    # bf16 output: tolerance loosened accordingly (kernel and ref both round to bf16).
    np.testing.assert_allclose(np.asarray(out), np.asarray(ref), rtol=2e-2, atol=2e-2)

    print("KERNEL_OK")
</pallas_src>

<mosaic_0001>
module attributes {stable_mosaic.version = 11 : i64} {
  func.func @made_kernel(%arg0: i32, %arg1: memref<512x8xf32, #tpu.memory_space<vmem>>, %arg2: memref<32x8xbf16, #tpu.memory_space<vmem>>, %arg3: memref<32x1xf32, #tpu.memory_space<vmem>>, %arg4: memref<32x32xbf16, #tpu.memory_space<vmem>>, %arg5: memref<32x1xf32, #tpu.memory_space<vmem>>, %arg6: memref<16x32xbf16, #tpu.memory_space<vmem>>, %arg7: memref<16x1xf32, #tpu.memory_space<vmem>>, %arg8: memref<16x512xbf16, #tpu.memory_space<vmem>>) attributes {dimension_semantics = [#tpu.dimension_semantics<parallel>], iteration_bounds = array<i64: 1>, scalar_prefetch = 0 : i64, scratch_operands = 0 : i64, tpu.core_type = #tpu.core_type<tc>, window_params = [{transform_indices = @transform_0, window_bounds = array<i64: 512, 8>}, {pipeline_mode = #tpu.pipeline_mode<synchronous>, transform_indices = @transform_1, window_bounds = array<i64: 32, 8>}, {pipeline_mode = #tpu.pipeline_mode<synchronous>, transform_indices = @transform_2, window_bounds = array<i64: 32, 1>}, {pipeline_mode = #tpu.pipeline_mode<synchronous>, transform_indices = @transform_3, window_bounds = array<i64: 32, 32>}, {pipeline_mode = #tpu.pipeline_mode<synchronous>, transform_indices = @transform_4, window_bounds = array<i64: 32, 1>}, {pipeline_mode = #tpu.pipeline_mode<synchronous>, transform_indices = @transform_5, window_bounds = array<i64: 16, 32>}, {pipeline_mode = #tpu.pipeline_mode<synchronous>, transform_indices = @transform_6, window_bounds = array<i64: 16, 1>}, {transform_indices = @transform_7, window_bounds = array<i64: 16, 512>}]} {
    %c0 = arith.constant 0 : index
    %c0_0 = arith.constant 0 : index
    %0 = vector.load %arg1[%c0, %c0_0] : memref<512x8xf32, #tpu.memory_space<vmem>>, vector<512x8xf32>
    %1 = arith.truncf %0 : vector<512x8xf32> to vector<512x8xbf16>
    %c0_1 = arith.constant 0 : index
    %c0_2 = arith.constant 0 : index
    %2 = vector.load %arg2[%c0_1, %c0_2] : memref<32x8xbf16, #tpu.memory_space<vmem>>, vector<32x8xbf16>
    %cst = arith.constant dense<0.000000e+00> : vector<32x512xf32>
    %3 = tpu.matmul %2, %1, %cst {dimension_numbers = #tpu.dot_dimension_numbers<[1], [1], [0], [0], [0, 0, 1, 0], [], []>} : vector<32x8xbf16>, vector<512x8xbf16>, vector<32x512xf32> -> vector<32x512xf32>
    %c0_3 = arith.constant 0 : index
    %c0_4 = arith.constant 0 : index
    %4 = vector.load %arg3[%c0_3, %c0_4] : memref<32x1xf32, #tpu.memory_space<vmem>>, vector<32x1xf32>
    %5 = vector.broadcast %4 : vector<32x1xf32> to vector<32x512xf32>
    %6 = arith.addf %3, %5 : vector<32x512xf32>
    %cst_5 = arith.constant 0.000000e+00 : f32
    %7 = vector.broadcast %cst_5 : f32 to vector<32x512xf32>
    %8 = arith.maximumf %6, %7 : vector<32x512xf32>
    %9 = arith.truncf %8 : vector<32x512xf32> to vector<32x512xbf16>
    %c0_6 = arith.constant 0 : index
    %c0_7 = arith.constant 0 : index
    %10 = vector.load %arg4[%c0_6, %c0_7] : memref<32x32xbf16, #tpu.memory_space<vmem>>, vector<32x32xbf16>
    %cst_8 = arith.constant dense<0.000000e+00> : vector<32x512xf32>
    %11 = tpu.matmul %10, %9, %cst_8 {dimension_numbers = #tpu.dot_dimension_numbers<[1], [0], [0], [1], [0, 0, 1, 1], [], []>} : vector<32x32xbf16>, vector<32x512xbf16>, vector<32x512xf32> -> vector<32x512xf32>
    %c0_9 = arith.constant 0 : index
    %c0_10 = arith.constant 0 : index
    %12 = vector.load %arg5[%c0_9, %c0_10] : memref<32x1xf32, #tpu.memory_space<vmem>>, vector<32x1xf32>
    %13 = vector.broadcast %12 : vector<32x1xf32> to vector<32x512xf32>
    %14 = arith.addf %11, %13 : vector<32x512xf32>
    %cst_11 = arith.constant 0.000000e+00 : f32
    %15 = vector.broadcast %cst_11 : f32 to vector<32x512xf32>
    %16 = arith.maximumf %14, %15 : vector<32x512xf32>
    %17 = arith.truncf %16 : vector<32x512xf32> to vector<32x512xbf16>
    %c0_12 = arith.constant 0 : index
    %c0_13 = arith.constant 0 : index
    %18 = vector.load %arg6[%c0_12, %c0_13] : memref<16x32xbf16, #tpu.memory_space<vmem>>, vector<16x32xbf16>
    %cst_14 = arith.constant dense<0.000000e+00> : vector<16x512xf32>
    %19 = tpu.matmul %18, %17, %cst_14 {dimension_numbers = #tpu.dot_dimension_numbers<[1], [0], [0], [1], [0, 0, 1, 1], [], []>} : vector<16x32xbf16>, vector<32x512xbf16>, vector<16x512xf32> -> vector<16x512xf32>
    %c0_15 = arith.constant 0 : index
    %c0_16 = arith.constant 0 : index
    %20 = vector.load %arg7[%c0_15, %c0_16] : memref<16x1xf32, #tpu.memory_space<vmem>>, vector<16x1xf32>
    %21 = vector.broadcast %20 : vector<16x1xf32> to vector<16x512xf32>
    %22 = arith.addf %19, %21 : vector<16x512xf32>
    %23 = arith.truncf %22 : vector<16x512xf32> to vector<16x512xbf16>
    %c0_17 = arith.constant 0 : index
    %c0_18 = arith.constant 0 : index
    %24 = vector.load %arg8[%c0_17, %c0_18] : memref<16x512xbf16, #tpu.memory_space<vmem>>, vector<16x512xbf16>
    tpu.vector_store %arg8[%c0_17, %c0_18], %23 {strides = array<i32>} : memref<16x512xbf16, #tpu.memory_space<vmem>>, vector<16x512xbf16>,
    return
  }
  func.func @transform_0(%arg0: i32) -> (i32, i32) {
    %c0_i32 = arith.constant 0 : i32
    %c0_i32_0 = arith.constant 0 : i32
    return %arg0, %c0_i32 : i32, i32
  }
  func.func @transform_1(%arg0: i32) -> (i32, i32) {
    %c0_i32 = arith.constant 0 : i32
    %c0_i32_0 = arith.constant 0 : i32
    %c0_i32_1 = arith.constant 0 : i32
    return %c0_i32, %c0_i32_0 : i32, i32
  }
  func.func @transform_2(%arg0: i32) -> (i32, i32) {
    %c0_i32 = arith.constant 0 : i32
    %c0_i32_0 = arith.constant 0 : i32
    %c0_i32_1 = arith.constant 0 : i32
    return %c0_i32, %c0_i32_0 : i32, i32
  }
  func.func @transform_3(%arg0: i32) -> (i32, i32) {
    %c0_i32 = arith.constant 0 : i32
    %c0_i32_0 = arith.constant 0 : i32
    %c0_i32_1 = arith.constant 0 : i32
    return %c0_i32, %c0_i32_0 : i32, i32
  }
  func.func @transform_4(%arg0: i32) -> (i32, i32) {
    %c0_i32 = arith.constant 0 : i32
    %c0_i32_0 = arith.constant 0 : i32
    %c0_i32_1 = arith.constant 0 : i32
    return %c0_i32, %c0_i32_0 : i32, i32
  }
  func.func @transform_5(%arg0: i32) -> (i32, i32) {
    %c0_i32 = arith.constant 0 : i32
    %c0_i32_0 = arith.constant 0 : i32
    %c0_i32_1 = arith.constant 0 : i32
    return %c0_i32, %c0_i32_0 : i32, i32
  }
  func.func @transform_6(%arg0: i32) -> (i32, i32) {
    %c0_i32 = arith.constant 0 : i32
    %c0_i32_0 = arith.constant 0 : i32
    %c0_i32_1 = arith.constant 0 : i32
    return %c0_i32, %c0_i32_0 : i32, i32
  }
  func.func @transform_7(%arg0: i32) -> (i32, i32) {
    %c0_i32 = arith.constant 0 : i32
    %c0_i32_0 = arith.constant 0 : i32
    return %c0_i32, %arg0 : i32, i32
  }
}

</mosaic_0001>

<bundles_post_ra>
// kernel: tpu_custom_call.1
= control target key start
LH: loop header
LB: loop body
LE: loop exit
PB: predicated region body
PF: predicated region fallthrough
CT: control target
= control target key end

     0   :  { %vm162_vm0 = vcmask 64512   ;;  %s1028_s0 = inlined_call_operand.vmem [shape: f32[512,8], index: 0, kind: input, shape index: {}]   ;;  %s1029_s1 = inlined_call_operand.vmem [shape: bf16[32,8], index: 1, kind: input, shape index: {}]   ;;  %s1030_s2 = inlined_call_operand.vmem [shape: f32[32,1], index: 2, kind: input, shape index: {}]   ;;  %s1031_s3 = inlined_call_operand.vmem [shape: bf16[32,32], index: 3, kind: input, shape index: {}]   ;;  %s1032_s4 = inlined_call_operand.vmem [shape: f32[32,1], index: 4, kind: input, shape index: {}]   ;;  %s1033_s5 = inlined_call_operand.vmem [shape: bf16[16,32], index: 5, kind: input, shape index: {}]   ;;  %s1034_s6 = inlined_call_operand.vmem [shape: f32[16,1], index: 6, kind: input, shape index: {}]   ;;  %s1035_s7 = inlined_call_operand.hbm [shape: bf16[16,512], index: 7, kind: output, shape index: {}]  }
   0x1   :  { %v42_v0 = vld [vmem:[%s1028_s0 + $0x70] sm:$0xff]  ;;  %v43_v1 = vld [vmem:[%s1028_s0 + $0x78] sm:$0xff]  ;;  %v40_v11 = vld [vmem:[%s1028_s0 + $0x60] sm:$0xff] }
   0x2   :  { %v58_v2 = vld [vmem:[%s1028_s0 + $0xf0] sm:$0xff]  ;;  %v99_v3 = vpack.c.bf16 %v43_v1, %v42_v0  ;;  %v59_v4 = vld [vmem:[%s1028_s0 + $0xf8] sm:$0xff]  ;;  %v41_v14 = vld [vmem:[%s1028_s0 + $0x68] sm:$0xff] }
   0x3   :  { %v74_v5 = vld [vmem:[%s1028_s0 + $0x170] sm:$0xff]  ;;  %v75_v6 = vld [vmem:[%s1028_s0 + $0x178] sm:$0xff]  ;;  %v107_v7 = vpack.c.bf16 %v59_v4, %v58_v2  ;;  %v56_v15 = vld [vmem:[%s1028_s0 + $0xe0] sm:$0xff]  ;;  %v98_v23 = vpack.c.bf16 %v41_v14, %v40_v11 }
   0x4   :  { %v115_v8 = vpack.c.bf16 %v75_v6, %v74_v5  ;;  %v90_v9 = vld [vmem:[%s1028_s0 + $0x1f0] sm:$0xff]  ;;  %v91_v10 = vld [vmem:[%s1028_s0 + $0x1f8] sm:$0xff]  ;;  %v191_v12 = vsel %vm162_vm0, %v99_v3, 0  ;;  %v57_v16 = vld [vmem:[%s1028_s0 + $0xe8] sm:$0xff] }
   0x5   :  { %v123_v13 = vpack.c.bf16 %v91_v10, %v90_v9  ;;  %265 = vmatpush.bf16.xpose.msra.mxu0 %v191_v12  ;;  %v215_v17 = vsel %vm162_vm0, %v107_v7, 0  ;;  %v72_v19 = vld [vmem:[%s1028_s0 + $0x160] sm:$0xff]  ;;  %v73_v20 = vld [vmem:[%s1028_s0 + $0x168] sm:$0xff]  ;;  %v106_v25 = vpack.c.bf16 %v57_v16, %v56_v15  ;;  %v188_v28 = vsel %vm162_vm0, %v98_v23, 0  ;;  %v38_v31 = vld [vmem:[%s1028_s0 + $0x50] sm:$0xff] }
   0x6   :  { %v239_v18 = vsel %vm162_vm0, %v115_v8, 0  ;;  %v88_v21 = vld [vmem:[%s1028_s0 + $0x1e0] sm:$0xff]  ;;  %284 = vmatpush.bf16.xpose.msra.mxu1 %v215_v17  ;;  %v89_v24 = vld [vmem:[%s1028_s0 + $0x1e8] sm:$0xff]  ;;  %v114_v26 = vpack.c.bf16 %v73_v20, %v72_v19  ;;  %v39_v32 = vld [vmem:[%s1028_s0 + $0x58] sm:$0xff] }
   0x7   :  { %303 = vmatpush.bf16.xpose.msra.mxu2 %v239_v18  ;;  %v263_v22 = vsel %vm162_vm0, %v123_v13, 0  ;;  %v122_v27 = vpack.c.bf16 %v89_v24, %v88_v21  ;;  %v212_v29 = vsel %vm162_vm0, %v106_v25, 0  ;;  %v54_v33 = vld [vmem:[%s1028_s0 + $0xd0] sm:$0xff]  ;;  %v55_v35 = vld [vmem:[%s1028_s0 + $0xd8] sm:$0xff]  ;;  %v97_v40 = vpack.c.bf16 %v39_v32, %v38_v31 }
   0x8   :  { %322 = vmatpush.bf16.xpose.msra.mxu3 %v263_v22  ;;  %v236_v30 = vsel %vm162_vm0, %v114_v26, 0  ;;  %v70_v36 = vld [vmem:[%s1028_s0 + $0x150] sm:$0xff]  ;;  %v71_v37 = vld [vmem:[%s1028_s0 + $0x158] sm:$0xff]  ;;  %v105_v41 = vpack.c.bf16 %v55_v35, %v54_v33 }
   0x9   :  { %v260_v34 = vsel %vm162_vm0, %v122_v27, 0  ;;  %v86_v38 = vld [vmem:[%s1028_s0 + $0x1d0] sm:$0xff]  ;;  %v87_v39 = vld [vmem:[%s1028_s0 + $0x1d8] sm:$0xff]  ;;  %v113_v42 = vpack.c.bf16 %v71_v37, %v70_v36 }
   0xa   :  { %v121_v43 = vpack.c.bf16 %v87_v39, %v86_v38 }
   0xd   :  { %266 = vmatpush.bf16.xpose.msra.mxu0 %v188_v28 }
   0xe   :  { %285 = vmatpush.bf16.xpose.msra.mxu1 %v212_v29 }
   0xf   :  { %304 = vmatpush.bf16.xpose.msra.mxu2 %v236_v30 }
  0x10   :  { %323 = vmatpush.bf16.xpose.msra.mxu3 %v260_v34 }
  0x11   :  { %12 = vsyncpa [#allocation3], 0  ;;  %v185_v44 = vsel %vm162_vm0, %v97_v40, 0  ;;  %v209_v45 = vsel %vm162_vm0, %v105_v41, 0  ;;  %v233_v46 = vsel %vm162_vm0, %v113_v42, 0  ;;  %v36_v47 = vld [vmem:[%s1028_s0 + $0x40] sm:$0xff] }
  0x12   :  { %v37_v48 = vld [vmem:[%s1028_s0 + $0x48] sm:$0xff]  ;;  %v52_v49 = vld [vmem:[%s1028_s0 + $0xc0] sm:$0xff]  ;;  %v257_v50 = vsel %vm162_vm0, %v121_v43, 0  ;;  %v34_v63 = vld [vmem:[%s1028_s0 + $0x30] sm:$0xff]  ;;  %v692_v28 = vmov 0   ;;  %vm403_vm1 = vcmask 261120  }
  0x13   :  { %v53_v51 = vld [vmem:[%s1028_s0 + $0xc8] sm:$0xff]  ;;  %v68_v52 = vld [vmem:[%s1028_s0 + $0x140] sm:$0xff]  ;;  %v96_v56 = vpack.c.bf16 %v37_v48, %v36_v47  ;;  %v35_v0 = vld [vmem:[%s1028_s0 + $0x38] sm:$0xff]  ;;  %663 = vset.pattern.permute.xlu0 %v692_v28  ;;  %664 = vset.pattern.permute.xlu1 %v692_v28  ;;  %s602_s18 = sshll.u32 %s1035_s7, 4  ;;  %s694_s19 = smov 256   ;;  %s603_s18 = int_to_ptr.hbm [resolvable:$true] %s602_s18 }
  0x14   :  { %v69_v53 = vld [vmem:[%s1028_s0 + $0x148] sm:$0xff]  ;;  %v84_v54 = vld [vmem:[%s1028_s0 + $0x1c0] sm:$0xff]  ;;  %v104_v57 = vpack.c.bf16 %v53_v51, %v52_v49  ;;  %v50_v1 = vld [vmem:[%s1028_s0 + $0xb0] sm:$0xff]  ;;  %v95_v8 = vpack.c.bf16 %v35_v0, %v34_v63  ;;  %665 = vset.pattern.permute.xlu2 %v692_v28 }
  0x15   :  { %267 = vmatpush.bf16.xpose.msra.mxu0 %v185_v44  ;;  %v85_v55 = vld [vmem:[%s1028_s0 + $0x1c8] sm:$0xff]  ;;  %v112_v58 = vpack.c.bf16 %v69_v53, %v68_v52  ;;  %v182_v60 = vsel %vm162_vm0, %v96_v56, 0  ;;  %v51_v3 = vld [vmem:[%s1028_s0 + $0xb8] sm:$0xff]  ;;  %v66_v4 = vld [vmem:[%s1028_s0 + $0x130] sm:$0xff] }
  0x16   :  { %286 = vmatpush.bf16.xpose.msra.mxu1 %v209_v45  ;;  %v120_v59 = vpack.c.bf16 %v85_v55, %v84_v54  ;;  %v206_v61 = vsel %vm162_vm0, %v104_v57, 0  ;;  %v67_v5 = vld [vmem:[%s1028_s0 + $0x138] sm:$0xff]  ;;  %v82_v6 = vld [vmem:[%s1028_s0 + $0x1b0] sm:$0xff]  ;;  %v103_v9 = vpack.c.bf16 %v51_v3, %v50_v1  ;;  %v179_v12 = vsel %vm162_vm0, %v95_v8, 0  ;;  %v32_v15 = vld [vmem:[%s1028_s0 + $0x20] sm:$0xff] }
  0x17   :  { %305 = vmatpush.bf16.xpose.msra.mxu2 %v233_v46  ;;  %v230_v62 = vsel %vm162_vm0, %v112_v58, 0  ;;  %v83_v7 = vld [vmem:[%s1028_s0 + $0x1b8] sm:$0xff]  ;;  %v111_v10 = vpack.c.bf16 %v67_v5, %v66_v4  ;;  %v33_v16 = vld [vmem:[%s1028_s0 + $0x28] sm:$0xff]  ;;  %v48_v17 = vld [vmem:[%s1028_s0 + $0xa0] sm:$0xff] }
  0x18   :  { %324 = vmatpush.bf16.xpose.msra.mxu3 %v257_v50  ;;  %v254_v2 = vsel %vm162_vm0, %v120_v59, 0  ;;  %v119_v11 = vpack.c.bf16 %v83_v7, %v82_v6  ;;  %v203_v13 = vsel %vm162_vm0, %v103_v9, 0  ;;  %v49_v19 = vld [vmem:[%s1028_s0 + $0xa8] sm:$0xff]  ;;  %v64_v20 = vld [vmem:[%s1028_s0 + $0x120] sm:$0xff]  ;;  %v94_v24 = vpack.c.bf16 %v33_v16, %v32_v15  ;;  %v130_v25 = vld [vmem:[%s1030_s2 + $0x10] sm:$0xff] }
  0x19   :  { %v227_v14 = vsel %vm162_vm0, %v111_v10, 0  ;;  %v65_v21 = vld [vmem:[%s1028_s0 + $0x128] sm:$0xff]  ;;  %v80_v22 = vld [vmem:[%s1028_s0 + $0x1a0] sm:$0xff]  ;;  %v102_v26 = vpack.c.bf16 %v49_v19, %v48_v17  ;;  %144 = vperm.xlu0 %663, %v130_v25   ;;  %v30_v33 = vld [vmem:[%s1028_s0 + $0x10] sm:$0xff] }
  0x1a   :  { %v251_v18 = vsel %vm162_vm0, %v119_v11, 0  ;;  %v81_v23 = vld [vmem:[%s1028_s0 + $0x1a8] sm:$0xff]  ;;  %v110_v27 = vpack.c.bf16 %v65_v21, %v64_v20  ;;  %v176_v30 = vsel %vm162_vm0, %v94_v24, 0  ;;  %v31_v34 = vld [vmem:[%s1028_s0 + $0x18] sm:$0xff]  ;;  %v46_v35 = vld [vmem:[%s1028_s0 + $0x90] sm:$0xff] }
  0x1b   :  { %v118_v29 = vpack.c.bf16 %v81_v23, %v80_v22  ;;  %v200_v31 = vsel %vm162_vm0, %v102_v26, 0  ;;  %v47_v37 = vld [vmem:[%s1028_s0 + $0x98] sm:$0xff]  ;;  %v62_v38 = vld [vmem:[%s1028_s0 + $0x110] sm:$0xff]  ;;  %v93_v42 = vpack.c.bf16 %v31_v34, %v30_v33  ;;  %v28_v49 = vld [vmem:[%s1028_s0] sm:$0xff] }
  0x1c   :  { %v224_v32 = vsel %vm162_vm0, %v110_v27, 0  ;;  %v63_v39 = vld [vmem:[%s1028_s0 + $0x118] sm:$0xff]  ;;  %v78_v40 = vld [vmem:[%s1028_s0 + $0x190] sm:$0xff]  ;;  %v101_v43 = vpack.c.bf16 %v47_v37, %v46_v35  ;;  %v29_v50 = vld [vmem:[%s1028_s0 + $0x8] sm:$0xff] }
  0x1d   :  { %268 = vmatpush.bf16.xpose.msra.mxu0 %v182_v60  ;;  %v248_v36 = vsel %vm162_vm0, %v118_v29, 0  ;;  %v79_v41 = vld [vmem:[%s1028_s0 + $0x198] sm:$0xff]  ;;  %v109_v44 = vpack.c.bf16 %v63_v39, %v62_v38  ;;  %v173_v46 = vsel %vm162_vm0, %v93_v42, 0  ;;  %v44_v51 = vld [vmem:[%s1028_s0 + $0x80] sm:$0xff]  ;;  %v45_v53 = vld [vmem:[%s1028_s0 + $0x88] sm:$0xff]  ;;  %v92_v58 = vpack.c.bf16 %v29_v50, %v28_v49 }
  0x1e   :  { %287 = vmatpush.bf16.xpose.msra.mxu1 %v206_v61  ;;  %v117_v45 = vpack.c.bf16 %v79_v41, %v78_v40  ;;  %v197_v47 = vsel %vm162_vm0, %v101_v43, 0  ;;  %v60_v54 = vld [vmem:[%s1028_s0 + $0x100] sm:$0xff]  ;;  %v61_v55 = vld [vmem:[%s1028_s0 + $0x108] sm:$0xff]  ;;  %v131_v59 = vld [vmem:[%s1030_s2 + $0x18] sm:$0xff]  ;;  %v100_v61 = vpack.c.bf16 %v45_v53, %v44_v51 }
  0x1f   :  { %306 = vmatpush.bf16.xpose.msra.mxu2 %v230_v62  ;;  %v221_v48 = vsel %vm162_vm0, %v109_v44, 0  ;;  %v76_v56 = vld [vmem:[%s1028_s0 + $0x180] sm:$0xff]  ;;  %v77_v57 = vld [vmem:[%s1028_s0 + $0x188] sm:$0xff]  ;;  %v108_v62 = vpack.c.bf16 %v61_v55, %v60_v54  ;;  %v170_v0 = vsel %vm162_vm0, %v92_v58, 0  ;;  %s695_s0 = smov 16  }
  0x20   :  { %325 = vmatpush.bf16.xpose.msra.mxu3 %v254_v2  ;;  %v245_v52 = vsel %vm162_vm0, %v117_v45, 0  ;;  %v128_v60 = vld [vmem:[%s1030_s2] sm:$0xff]  ;;  %v116_v63 = vpack.c.bf16 %v77_v57, %v76_v56  ;;  %v194_v1 = vsel %vm162_vm0, %v100_v61, 0  ;;  %v129_v5 = vld [vmem:[%s1030_s2 + $0x8] sm:$0xff] }
  0x21   :  { %149 = vperm.xlu0 %663, %v131_v59   ;;  %134 = vperm.xlu1 %664, %v128_v60   ;;  %v218_v2 = vsel %vm162_vm0, %v108_v62, 0  ;;  %v369_v4 = vld [vmem:[%s1032_s4] sm:$0xff]  ;;  %v513_v7 = vld [vmem:[%s1034_s6 + $0x8] sm:$0xff] }
  0x22   :  { %v242_v3 = vsel %vm162_vm0, %v116_v63, 0  ;;  %v654_v6 = vld [vmem:[%s1029_s1] sm:$0xff]  ;;  %v370_v8 = vld [vmem:[%s1032_s4 + $0x8] sm:$0xff] }
  0x23   :  { %v655_v9 = vld [vmem:[%s1029_s1 + $0x8] sm:$0xff]  ;;  %v656_v60 = vld [vmem:[%s1031_s3] sm:$0xff] }
  0x25   :  { %269 = vmatpush.bf16.xpose.msra.mxu0 %v179_v12 }
  0x26   :  { %288 = vmatpush.bf16.xpose.msra.mxu1 %v203_v13 }
  0x27   :  { %307 = vmatpush.bf16.xpose.msra.mxu2 %v227_v14 }
  0x28   :  { %326 = vmatpush.bf16.xpose.msra.mxu3 %v251_v18 }
  0x29   :  { %375 = vperm.xlu0 %663, %v369_v4   ;;  %139 = vperm.xlu1 %664, %v129_v5   ;;  %v372_v4 = vld [vmem:[%s1032_s4 + $0x18] sm:$0xff] }
  0x2d   :  { %270 = vmatpush.bf16.xpose.msra.mxu0 %v176_v30 }
  0x2e   :  { %289 = vmatpush.bf16.xpose.msra.mxu1 %v200_v31 }
  0x2f   :  { %308 = vmatpush.bf16.xpose.msra.mxu2 %v224_v32 }
  0x30   :  { %327 = vmatpush.bf16.xpose.msra.mxu3 %v248_v36 }
  0x31   :  { %521 = vperm.xlu0 %663, %v513_v7   ;;  %380 = vperm.xlu1 %664, %v370_v8  }
  0x35   :  { %271 = vmatpush.bf16.xpose.msra.mxu0 %v173_v46 }
  0x36   :  { %290 = vmatpush.bf16.xpose.msra.mxu1 %v197_v47  ;;  %v371_v47 = vld [vmem:[%s1032_s4 + $0x10] sm:$0xff] }
  0x37   :  { %309 = vmatpush.bf16.xpose.msra.mxu2 %v221_v48  ;;  %385 = vperm.xlu2 %665, %v371_v47  }
  0x38   :  { %328 = vmatpush.bf16.xpose.msra.mxu3 %v245_v52 }
  0x3d   :  { %272 = vmatpush.bf16.xpose.msra.mxu0 %v170_v0 }
  0x3e   :  { %291 = vmatpush.bf16.xpose.msra.mxu1 %v194_v1 }
  0x3f   :  { %310 = vmatpush.bf16.xpose.msra.mxu2 %v218_v2  ;;  %390 = vperm.xlu2 %665, %v372_v4  }
  0x40   :  { %329 = vmatpush.bf16.xpose.msra.mxu3 %v242_v3 }
  0x44   :  { %622 = vmatmul.msk.bf16.vlgmr.msra.gmra.mxu0 %vm162_vm0, %v654_v6 }
  0x45   :  { %624 = vmatmul.msk.bf16.vlgmr.msra.gmra.mxu1 %vm162_vm0, %v654_v6 }
  0x46   :  { %626 = vmatmul.msk.bf16.vlgmr.msra.gmra.mxu2 %vm162_vm0, %v654_v6 }
  0x47   :  { %628 = vmatmul.msk.bf16.vlgmr.msra.gmra.mxu3 %vm162_vm0, %v654_v6 }
  0x54   :  { %623 = vmatmul.msk.bf16.gmra.mxu0 %vm162_vm0, %v655_v9 }
  0x55   :  { %625 = vmatmul.msk.bf16.gmra.mxu1 %vm162_vm0, %v655_v9 }
  0x56   :  { %627 = vmatmul.msk.bf16.gmra.mxu2 %vm162_vm0, %v655_v9 }
  0x57   :  { %629 = vmatmul.msk.bf16.gmra.mxu3 %vm162_vm0, %v655_v9  ;;  %v512_v9 = vld [vmem:[%s1034_s6] sm:$0xff] }
  0x58   :  { %516 = vperm.xlu2 %665, %v512_v9  }
  0x8b   :  { %v145_v16 = vpop.permute.xlu0 %144 }
  0x93   :  { %v135_v17 = vpop.permute.xlu1 %134  ;;  %v150_v22 = vpop.permute.xlu0 %149 }
  0x9b   :  { %v140_v23 = vpop.permute.xlu1 %139 }
  0xc1   :  { %v274_v10 = vpop.f32.mrf.mxu0 }
  0xc2   :  { %v293_v11 = vpop.f32.mrf.mxu1  ;;  %v275_v31 = vadd.f32 %v274_v10, %v135_v17  ;;  %v657_v10 = vld [vmem:[%s1031_s3 + $0x8] sm:$0xff] }
  0xc3   :  { %v294_v34 = vadd.f32 %v293_v11, %v135_v17 }
  0xc4   :  { %v341_v41 = vmax.f32 %v275_v31, 0.0  ;;  %v376_v31 = vpop.permute.xlu0 %375 }
  0xc5   :  { %v342_v45 = vmax.f32 %v294_v34, 0.0 }
  0xc9   :  { %v312_v12 = vpop.f32.mrf.mxu2  ;;  %v276_v14 = vpop.f32.mrf.mxu0 }
  0xca   :  { %v331_v13 = vpop.f32.mrf.mxu3  ;;  %v295_v15 = vpop.f32.mrf.mxu1  ;;  %v277_v32 = vadd.f32 %v276_v14, %v140_v23  ;;  %v313_v56 = vadd.f32 %v312_v12, %v135_v17 }
  0xcb   :  { %v296_v35 = vadd.f32 %v295_v15, %v140_v23  ;;  %v332_v61 = vadd.f32 %v331_v13, %v135_v17 }
  0xcc   :  { %v345_v42 = vmax.f32 %v277_v32, 0.0  ;;  %v343_v5 = vmax.f32 %v313_v56, 0.0 }
  0xcd   :  { %v346_v46 = vmax.f32 %v296_v35, 0.0  ;;  %v344_v6 = vmax.f32 %v332_v61, 0.0 }
  0xce   :  { %v357_v55 = vpack.c.bf16 %v345_v42, %v341_v41 }
  0xcf   :  { %v358_v59 = vpack.c.bf16 %v346_v46, %v342_v45 }
  0xd1   :  { %v314_v18 = vpop.f32.mrf.mxu2  ;;  %v279_v20 = vpop.f32.mrf.mxu0 }
  0xd2   :  { %v333_v19 = vpop.f32.mrf.mxu3  ;;  %v298_v21 = vpop.f32.mrf.mxu1  ;;  %v280_v24 = vadd.f32 %v279_v20, %v145_v16  ;;  %v315_v50 = vadd.f32 %v314_v18, %v140_v23 }
  0xd3   :  { %v299_v26 = vadd.f32 %v298_v21, %v145_v16  ;;  %v334_v53 = vadd.f32 %v333_v19, %v140_v23 }
  0xd4   :  { %v349_v36 = vmax.f32 %v280_v24, 0.0  ;;  %v347_v0 = vmax.f32 %v315_v50, 0.0  ;;  %v381_v24 = vpop.permute.xlu1 %380 }
  0xd5   :  { %v350_v38 = vmax.f32 %v299_v26, 0.0  ;;  %v348_v2 = vmax.f32 %v334_v53, 0.0 }
  0xd6   :  { %v359_v7 = vpack.c.bf16 %v347_v0, %v343_v5 }
  0xd7   :  { %v360_v8 = vpack.c.bf16 %v348_v2, %v344_v6 }
  0xd9   :  { %v317_v25 = vpop.f32.mrf.mxu2  ;;  %v281_v28 = vpop.f32.mrf.mxu0 }
  0xda   :  { %v336_v27 = vpop.f32.mrf.mxu3  ;;  %v282_v29 = vadd.f32 %v281_v28, %v150_v22  ;;  %v300_v30 = vpop.f32.mrf.mxu1  ;;  %v318_v43 = vadd.f32 %v317_v25, %v145_v16 }
  0xdb   :  { %v301_v33 = vadd.f32 %v300_v30, %v150_v22  ;;  %v337_v48 = vadd.f32 %v336_v27, %v145_v16  ;;  %v386_v16 = vpop.permute.xlu2 %385 }
  0xdc   :  { %v353_v37 = vmax.f32 %v282_v29, 0.0  ;;  %v351_v57 = vmax.f32 %v318_v43, 0.0 }
  0xdd   :  { %v354_v39 = vmax.f32 %v301_v33, 0.0  ;;  %v352_v62 = vmax.f32 %v337_v48, 0.0 }
  0xde   :  { %v361_v40 = vpack.c.bf16 %v353_v37, %v349_v36 }
  0xdf   :  { %v362_v44 = vpack.c.bf16 %v354_v39, %v350_v38 }
  0xe0   :  { %416 = vmatpush.bf16.msrb.mxu0 %v361_v40 }
  0xe1   :  { %v319_v49 = vpop.f32.mrf.mxu2  ;;  %435 = vmatpush.bf16.msrb.mxu1 %v362_v44 }
  0xe2   :  { %v320_v51 = vadd.f32 %v319_v49, %v150_v22  ;;  %v338_v52 = vpop.f32.mrf.mxu3  ;;  %v658_v49 = vld [vmem:[%s1033_s5] sm:$0xff]  ;;  %s693_s5 = smov [#allocation2]  }
  0xe3   :  { %v339_v54 = vadd.f32 %v338_v52, %v150_v22  ;;  %v391_v25 = vpop.permute.xlu2 %390  ;;  %s600_s15 = sshll.u32 %s693_s5, 4  ;;  %s601_s15 = int_to_ptr.vmem [resolvable:$true] %s600_s15 }
  0xe4   :  { %v355_v58 = vmax.f32 %v320_v51, 0.0  ;;  %417 = vmatpush.bf16.msrb.mxu0 %v357_v55 }
  0xe5   :  { %v356_v63 = vmax.f32 %v339_v54, 0.0  ;;  %436 = vmatpush.bf16.msrb.mxu1 %v358_v59 }
  0xe6   :  { %v363_v1 = vpack.c.bf16 %v355_v58, %v351_v57 }
  0xe7   :  { %v364_v3 = vpack.c.bf16 %v356_v63, %v352_v62  ;;  %638 = vmatmul.msk.bf16.vlgmr.msrb.gmra.mxu0 %vm403_vm1, %v656_v60 }
  0xe8   :  { %454 = vmatpush.bf16.msrb.mxu2 %v363_v1  ;;  %640 = vmatmul.msk.bf16.vlgmr.msrb.gmra.mxu1 %vm403_vm1, %v656_v60 }
  0xe9   :  { %473 = vmatpush.bf16.msrb.mxu3 %v364_v3 }
  0xec   :  { %455 = vmatpush.bf16.msrb.mxu2 %v359_v7 }
  0xed   :  { %474 = vmatpush.bf16.msrb.mxu3 %v360_v8  ;;  %v517_v8 = vpop.permute.xlu2 %516 }
  0xef   :  { %642 = vmatmul.msk.bf16.vlgmr.msrb.gmra.mxu2 %vm403_vm1, %v656_v60 }
  0xf0   :  { %644 = vmatmul.msk.bf16.vlgmr.msrb.gmra.mxu3 %vm403_vm1, %v656_v60 }
  0xf7   :  { %639 = vmatmul.msk.bf16.gmra.mxu0 %vm403_vm1, %v657_v10 }
  0xf8   :  { %641 = vmatmul.msk.bf16.gmra.mxu1 %vm403_vm1, %v657_v10 }
  0xff   :  { %643 = vmatmul.msk.bf16.gmra.mxu2 %vm403_vm1, %v657_v10 }
 0x100   :  { %645 = vmatmul.msk.bf16.gmra.mxu3 %vm403_vm1, %v657_v10 }
 0x164   :  { %v419_v11 = vpop.f32.mrf.mxu0 }
 0x165   :  { %v438_v12 = vpop.f32.mrf.mxu1  ;;  %v420_v35 = vadd.f32 %v419_v11, %v376_v31 }
 0x166   :  { %v439_v37 = vadd.f32 %v438_v12, %v376_v31 }
 0x167   :  { %v486_v45 = vmax.f32 %v420_v35, 0.0 }
 0x168   :  { %v487_v46 = vmax.f32 %v439_v37, 0.0 }
 0x16c   :  { %v421_v13 = vpop.f32.mrf.mxu0 }
 0x16d   :  { %v440_v14 = vpop.f32.mrf.mxu1  ;;  %v422_v27 = vadd.f32 %v421_v13, %v381_v24 }
 0x16e   :  { %v441_v32 = vadd.f32 %v440_v14, %v381_v24  ;;  %v522_v14 = vpop.permute.xlu0 %521 }
 0x16f   :  { %v490_v39 = vmax.f32 %v422_v27, 0.0 }
 0x170   :  { %v491_v42 = vmax.f32 %v441_v32, 0.0 }
 0x171   :  { %v502_v47 = vpack.c.bf16 %v490_v39, %v486_v45 }
 0x172   :  { %v457_v15 = vpop.f32.mrf.mxu2  ;;  %v503_v48 = vpack.c.bf16 %v491_v42, %v487_v46 }
 0x173   :  { %v476_v17 = vpop.f32.mrf.mxu3  ;;  %v458_v58 = vadd.f32 %v457_v15, %v376_v31 }
 0x174   :  { %v424_v18 = vpop.f32.mrf.mxu0  ;;  %v477_v61 = vadd.f32 %v476_v17, %v376_v31 }
 0x175   :  { %v443_v19 = vpop.f32.mrf.mxu1  ;;  %v425_v20 = vadd.f32 %v424_v18, %v386_v16  ;;  %v488_v4 = vmax.f32 %v458_v58, 0.0 }
 0x176   :  { %v444_v22 = vadd.f32 %v443_v19, %v386_v16  ;;  %v489_v5 = vmax.f32 %v477_v61, 0.0 }
 0x177   :  { %v494_v28 = vmax.f32 %v425_v20, 0.0 }
 0x178   :  { %v495_v33 = vmax.f32 %v444_v22, 0.0 }
 0x17a   :  { %v459_v21 = vpop.f32.mrf.mxu2 }
 0x17b   :  { %v478_v23 = vpop.f32.mrf.mxu3  ;;  %v460_v53 = vadd.f32 %v459_v21, %v381_v24 }
 0x17c   :  { %v426_v26 = vpop.f32.mrf.mxu0  ;;  %v479_v56 = vadd.f32 %v478_v23, %v381_v24 }
 0x17d   :  { %v427_v29 = vadd.f32 %v426_v26, %v391_v25  ;;  %v445_v30 = vpop.f32.mrf.mxu1  ;;  %v492_v0 = vmax.f32 %v460_v53, 0.0 }
 0x17e   :  { %v446_v34 = vadd.f32 %v445_v30, %v391_v25  ;;  %v493_v2 = vmax.f32 %v479_v56, 0.0 }
 0x17f   :  { %v498_v36 = vmax.f32 %v427_v29, 0.0  ;;  %v504_v6 = vpack.c.bf16 %v492_v0, %v488_v4 }
 0x180   :  { %v499_v38 = vmax.f32 %v446_v34, 0.0  ;;  %v505_v7 = vpack.c.bf16 %v493_v2, %v489_v5 }
 0x181   :  { %v506_v40 = vpack.c.bf16 %v498_v36, %v494_v28 }
 0x182   :  { %v462_v41 = vpop.f32.mrf.mxu2  ;;  %v507_v43 = vpack.c.bf16 %v499_v38, %v495_v33 }
 0x183   :  { %v481_v44 = vpop.f32.mrf.mxu3  ;;  %538 = vmatpush.bf16.msra.mxu0 %v506_v40  ;;  %v463_v50 = vadd.f32 %v462_v41, %v386_v16 }
 0x184   :  { %552 = vmatpush.bf16.msra.mxu1 %v507_v43  ;;  %v482_v51 = vadd.f32 %v481_v44, %v386_v16 }
 0x185   :  { %v496_v59 = vmax.f32 %v463_v50, 0.0 }
 0x186   :  { %v497_v62 = vmax.f32 %v482_v51, 0.0 }
 0x187   :  { %539 = vmatpush.bf16.msra.mxu0 %v502_v47 }
 0x188   :  { %553 = vmatpush.bf16.msra.mxu1 %v503_v48 }
 0x18a   :  { %v464_v52 = vpop.f32.mrf.mxu2  ;;  %650 = vmatmul.msk.bf16.vlgmr.msra.gmra.mxu0 %vm403_vm1, %v658_v49 }
 0x18b   :  { %v465_v54 = vadd.f32 %v464_v52, %v391_v25  ;;  %v483_v55 = vpop.f32.mrf.mxu3  ;;  %651 = vmatmul.msk.bf16.vlgmr.msra.gmra.mxu1 %vm403_vm1, %v658_v49 }
 0x18c   :  { %v484_v57 = vadd.f32 %v483_v55, %v391_v25 }
 0x18d   :  { %v500_v60 = vmax.f32 %v465_v54, 0.0 }
 0x18e   :  { %v501_v63 = vmax.f32 %v484_v57, 0.0 }
 0x18f   :  { %v508_v1 = vpack.c.bf16 %v500_v60, %v496_v59 }
 0x190   :  { %v509_v3 = vpack.c.bf16 %v501_v63, %v497_v62 }
 0x191   :  { %566 = vmatpush.bf16.msra.mxu2 %v508_v1 }
 0x192   :  { %580 = vmatpush.bf16.msra.mxu3 %v509_v3 }
 0x195   :  { %567 = vmatpush.bf16.msra.mxu2 %v504_v6 }
 0x196   :  { %581 = vmatpush.bf16.msra.mxu3 %v505_v7 }
 0x198   :  { %652 = vmatmul.msk.bf16.vlgmr.msra.gmra.mxu2 %vm403_vm1, %v658_v49 }
 0x199   :  { %653 = vmatmul.msk.bf16.vlgmr.msra.gmra.mxu3 %vm403_vm1, %v658_v49 }
 0x207   :  { %v541_v9 = vpop.f32.mrf.mxu0 }
 0x208   :  { %v542_v10 = vadd.f32 %v541_v9, %v517_v8  ;;  %v555_v11 = vpop.f32.mrf.mxu1 }
 0x209   :  { %v556_v12 = vadd.f32 %v555_v11, %v517_v8 }
 0x20b   :  { %v588_v13 = vpack.c.bf16 %v556_v12, %v542_v10 }
 0x20d   :  { %592 = vst [vmem:[#allocation2] sm:$0xff] %v588_v13 }
 0x20f   :  { %v543_v15 = vpop.f32.mrf.mxu0 }
 0x210   :  { %v544_v16 = vadd.f32 %v543_v15, %v522_v14  ;;  %v557_v17 = vpop.f32.mrf.mxu1 }
 0x211   :  { %v558_v18 = vadd.f32 %v557_v17, %v522_v14 }
 0x213   :  { %v590_v19 = vpack.c.bf16 %v558_v18, %v544_v16 }
 0x215   :  { %594 = vst [vmem:[#allocation2 + $0x10] sm:$0xff] %v590_v19 }
 0x21b   :  { %v569_v20 = vpop.f32.mrf.mxu2 }
 0x21c   :  { %v570_v21 = vadd.f32 %v569_v20, %v517_v8  ;;  %v583_v22 = vpop.f32.mrf.mxu3 }
 0x21d   :  { %v584_v23 = vadd.f32 %v583_v22, %v517_v8 }
 0x21f   :  { %v589_v24 = vpack.c.bf16 %v584_v23, %v570_v21 }
 0x221   :  { %593 = vst [vmem:[#allocation2 + $0x8] sm:$0xff] %v589_v24 }
 0x223   :  { %v571_v25 = vpop.f32.mrf.mxu2 }
 0x224   :  { %v572_v26 = vadd.f32 %v571_v25, %v522_v14  ;;  %v585_v27 = vpop.f32.mrf.mxu3 }
 0x225   :  { %v586_v28 = vadd.f32 %v585_v27, %v522_v14 }
 0x227   :  { %v591_v29 = vpack.c.bf16 %v586_v28, %v572_v26 }
 0x229   :  { %595 = vst [vmem:[#allocation2 + $0x18] sm:$0xff] %v591_v29 }
 0x22a   :  { %608 = dma.vmem_to_hbm [thread:$0]  %s601_s15, 512, %s603_s18, [#allocation3], %s694_s19, %s694_s19, %s695_s0  }
 0x22b   :  { %690 = dma.done.wait [#allocation3], 512  }
 0x22c   :  { %691 = vsyncadd [#allocation3], 4294966784 }
 0x22d   :  { %613 = vsyncpa [#allocation3], 1 }

</bundles_post_ra>
